<compile_context>
chip_gen: v5e
topology: v5e:2x2
jax: 0.10.0
libtpu: 0.0.40
codegen_flags: <defaults>
</compile_context>

<pallas_src>
import functools

import jax
import jax.numpy as jnp
import numpy as np
from jax.experimental import pallas as pl
from jax.experimental.pallas import tpu as pltpu


def _round_up(x: int, m: int) -> int:
    return (x + m - 1) // m * m


def _vmem_capacity_bytes() -> int:
    try:
        return int(pltpu.get_tpu_info().vmem_capacity_bytes)
    except Exception:
        return 64 * 1024 * 1024  # conservative: assume the smallest (v7x) VMEM


def _pick_tile_l(L: int, d_pad: int, pad_r: int) -> int:
    """Generation-aware sequence-tile length.

    Target ~VMEM/32 per (TL, D) f32 block (2 MiB on 64 MiB v7x, 4 MiB on
    128 MiB v5e/v6e) so double-buffered input/output blocks plus f32
    temporaries fit comfortably, while TL stays large enough to amortize the
    ~0.35 us per-grid-step overhead and fill the MXU's M dimension.  When
    possible TL is snapped to a divisor of L so no padded HBM activation copy
    is ever created.
    """
    vmem = _vmem_capacity_bytes()
    target = max(vmem // 32, 2 * 1024 * 1024)
    cap = 2048 if vmem > 64 * 1024 * 1024 else 1024
    tl = target // (4 * d_pad)
    tl = max(pad_r, min(tl, cap))
    tl = (tl // pad_r) * pad_r
    tl = min(tl, _round_up(L, pad_r))
    tl = max(tl, pad_r)
    if L % pad_r == 0:
        for cand in range(tl, pad_r - 1, -pad_r):
            if L % cand == 0 and cand * 4 >= tl:   # exact divisor, not too small
                return cand
    return tl


def _fused_dwpw_kernel(halo_tbl_ref, x_ref, xh_ref, wdw_ref, bdw_ref, wpw_ref,
                       bpw_ref, o_ref, *, kernel_size: int, dilation: int,
                       pad_r: int):
    """One (batch, L-tile) grid step.  All tiles are independent (halo re-read).

    x_ref   : (1, TL, D)        input tile (channels-last, caller dtype)
    xh_ref  : (1, pad_r, D)     the pad_r rows immediately preceding this tile
    wdw_ref : (K, D)   f32      depthwise weights (tap-major, channel on lanes)
    bdw_ref : (1, D)   f32      depthwise bias
    wpw_ref : (D, D)   bf16     pointwise weights, transposed -> (D_in, D_out)
    bpw_ref : (1, D)   f32      pointwise bias
    o_ref   : (1, TL, D)        output tile
    """
    del halo_tbl_ref  # only consumed by the index_maps
    x = x_ref[0].astype(jnp.float32)                   # (TL, D)
    tl = x.shape[0]
    w_dw = wdw_ref[...]                                # (K, D) f32

    # ---- depthwise causal conv: out[t, c] = sum_j x[t - (K-1-j)*dil, c]*w[j, c]
    # shift-0 tap initialises the accumulator (saves one full-tile VPU add).
    acc = x * w_dw[kernel_size - 1, :]
    if kernel_size > 1:
        # Causal history for this tile; the first tile's halo is junk data at
        # block 0, zeroed here (zero left padding of the causal conv).
        not_first = (pl.program_id(1) > 0).astype(jnp.float32)
        hist = xh_ref[0].astype(jnp.float32) * not_first      # (pad_r, D)
        # [history | current] as a register-resident value; taps are static
        # sublane-shifted slices of it (XLU shifts) -- no scratch staging
        # store, no VMEM re-loads, no per-element masks.
        xext = jnp.concatenate([hist, x], axis=0)             # (pad_r + TL, D)
        for j in range(kernel_size - 1):
            shift = (kernel_size - 1 - j) * dilation           # 1 <= shift <= pad_r
            start = pad_r - shift
            tap = xext[start:start + tl, :]
            acc = acc + tap * w_dw[j, :]
    h = acc + bdw_ref[...]                              # (TL, D) f32

    # ---- pointwise 1x1 conv on the MXU (bf16 operands, f32 accumulation)
    y = jnp.dot(h.astype(jnp.bfloat16), wpw_ref[...],
                preferred_element_type=jnp.float32)
    y = y + bpw_ref[...]

    # ---- SiLU: exp and approximate reciprocal run on the EUP slot.
    y = y * pl.reciprocal(1.0 + jnp.exp(-y), approx=True)

    o_ref[0] = y.astype(o_ref.dtype)


def fused_dwpw_conv(x, w_dw, b_dw, w_pw, b_pw, *, kernel_size: int,
                    dilation: int, tile_l=None):
    """Fused depthwise-causal conv -> pointwise conv -> SiLU (eval mode).

    x    : (B, L, D) activations (same layout/dtype as the PyTorch module I/O).
    w_dw : (K, D)    depthwise weights  (PyTorch depth_conv.weight is (D,1,K)).
    b_dw : (1, D)    depthwise bias.
    w_pw : (D, D)    pointwise weights  (PyTorch point_conv.weight is (D,D,1)).
    b_pw : (1, D)    pointwise bias.
    """
    B, L, D = x.shape
    pad = (kernel_size - 1) * dilation
    pad_r = _round_up(max(pad, 1), 8)          # halo rows: >= pad, multiple of 8
    d_pad = _round_up(D, 128)                  # lane-dense channel dim

    if tile_l is None:
        tile_l = _pick_tile_l(L, d_pad, pad_r)
    tile_l = max(_round_up(int(tile_l), pad_r), pad_r)
    l_pad = _round_up(L, tile_l)
    n_l = l_pad // tile_l

    # Pad activations only when ragged (avoids extra HBM round-trips otherwise).
    if (l_pad, d_pad) != (L, D):
        xp = jnp.pad(x, ((0, 0), (0, l_pad - L), (0, d_pad - D)))
    else:
        xp = x

    w_dw_p = w_dw.astype(jnp.float32)
    b_dw_p = b_dw.astype(jnp.float32)
    w_pw_p = w_pw
    b_pw_p = b_pw.astype(jnp.float32)
    if d_pad != D:
        w_dw_p = jnp.pad(w_dw_p, ((0, 0), (0, d_pad - D)))
        b_dw_p = jnp.pad(b_dw_p, ((0, 0), (0, d_pad - D)))
        w_pw_p = jnp.pad(w_pw_p, ((0, d_pad - D), (0, d_pad - D)))
        b_pw_p = jnp.pad(b_pw_p, ((0, 0), (0, d_pad - D)))
    # (D_out, D_in) -> (D_in, D_out) and bf16 at the boundary (halves resident
    # weight bytes; f32 accumulation preserved in-kernel).
    w_pw_t = w_pw_p.T.astype(jnp.bfloat16)

    # Scalar-prefetch table: block index (in units of pad_r rows) of the causal
    # halo preceding each L-tile.  Tile 0 points at block 0; the kernel zeroes
    # it (zero left padding).
    c = tile_l // pad_r
    halo_idx = jnp.asarray(np.maximum(np.arange(n_l, dtype=np.int32) * c - 1, 0))

    kernel = functools.partial(_fused_dwpw_kernel, kernel_size=kernel_size,
                               dilation=dilation, pad_r=pad_r)

    vmem_cap = _vmem_capacity_bytes()
    vmem_limit = int(min(vmem_cap * 3 // 4, 96 * 1024 * 1024))

    itemsize = int(jnp.dtype(xp.dtype).itemsize)
    flops = int(2 * B * l_pad * d_pad * d_pad + 2 * B * l_pad * d_pad * kernel_size)
    bytes_accessed = int((2 * B * l_pad + B * n_l * pad_r) * d_pad * itemsize  # x+halo+out
                         + d_pad * d_pad * 2                                   # bf16 W_pw
                         + (kernel_size + 2) * d_pad * 4)                      # dw W + biases

    def make_call(single_buffer_consts: bool):
        # Constant operands never change across the grid: one buffer is enough.
        cmode = {"pipeline_mode": pl.Buffered(1)} if single_buffer_consts else {}
        return pl.pallas_call(
            kernel,
            out_shape=jax.ShapeDtypeStruct((B, l_pad, d_pad), x.dtype),
            grid_spec=pltpu.PrefetchScalarGridSpec(
                num_scalar_prefetch=1,
                grid=(B, n_l),
                in_specs=[
                    pl.BlockSpec((1, tile_l, d_pad), lambda b, l, t: (b, l, 0)),      # x tile
                    pl.BlockSpec((1, pad_r, d_pad), lambda b, l, t: (b, t[l], 0)),    # halo
                    pl.BlockSpec((kernel_size, d_pad), lambda b, l, t: (0, 0), **cmode),  # dw W
                    pl.BlockSpec((1, d_pad), lambda b, l, t: (0, 0), **cmode),            # dw b
                    pl.BlockSpec((d_pad, d_pad), lambda b, l, t: (0, 0), **cmode),        # pw W^T
                    pl.BlockSpec((1, d_pad), lambda b, l, t: (0, 0), **cmode),            # pw b
                ],
                out_specs=pl.BlockSpec((1, tile_l, d_pad), lambda b, l, t: (b, l, 0)),
            ),
            compiler_params=pltpu.CompilerParams(
                # Every tile is independent thanks to the halo re-read ->
                # both axes parallel (v7x 2-TC scaling even for B == 1).
                dimension_semantics=("parallel", "parallel"),
                vmem_limit_bytes=vmem_limit,
            ),
            cost_estimate=pl.CostEstimate(
                flops=flops,
                transcendentals=int(B * l_pad * d_pad),
                bytes_accessed=bytes_accessed,
            ),
        )

    args = (halo_idx, xp, xp, w_dw_p, b_dw_p, w_pw_t, b_pw_p)
    try:
        out = make_call(True)(*args)
    except Exception:
        # This JAX build may not accept per-operand buffer counts; fall back to
        # default double buffering (identical semantics).
        out = make_call(False)(*args)

    if (l_pad, d_pad) != (L, D):
        out = out[:, :L, :D]
    return out


def _reference(x, w_dw, b_dw, w_pw, b_pw, kernel_size, dilation):
    """Pure-JAX reference matching the PyTorch forward (eval mode), with the
    same bf16 rounding of the pointwise-matmul operands as the kernel."""
    B, L, D = x.shape
    pad = (kernel_size - 1) * dilation
    xp = jnp.pad(x.astype(jnp.float32), ((0, 0), (pad, 0), (0, 0)))
    h = jnp.zeros((B, L, D), jnp.float32)
    for j in range(kernel_size):
        h = h + xp[:, j * dilation: j * dilation + L, :] * w_dw[j][None, None, :]
    h = h + b_dw[0][None, None, :]
    y = jnp.einsum("bld,ed->ble", h.astype(jnp.bfloat16),
                   w_pw.astype(jnp.bfloat16),
                   preferred_element_type=jnp.float32)
    y = y + b_pw[0][None, None, :]
    return y * jax.nn.sigmoid(y)


if __name__ == "__main__":
    # (B, L, D, kernel_size, dilation, tile_l, dtype)
    configs = [
        (2, 64, 128, 3, 2, 16, jnp.float32),    # lane-dense, 4 L-tiles: halo causality
        (1, 37, 96, 3, 2, 16, jnp.float32),     # ragged L and D: padding paths
        (1, 64, 128, 3, 4, 16, jnp.float32),    # dilation reaching a full halo block
        (2, 64, 128, 3, 2, None, jnp.float32),  # auto tile length
        (2, 64, 128, 3, 2, 16, jnp.bfloat16),   # bf16 I/O end-to-end
    ]

    key = jax.random.PRNGKey(0)
    for (B, L, D, K, DIL, TL, DT) in configs:
        key, kx, k1, k2, k3, k4 = jax.random.split(key, 6)

        x = jax.random.normal(kx, (B, L, D), dtype=jnp.float32).astype(DT)
        # PyTorch depth_conv.weight is (D, 1, K) -> stored here as (K, D).
        w_dw = jax.random.normal(k1, (K, D), dtype=jnp.float32) * 0.2
        b_dw = jax.random.normal(k2, (1, D), dtype=jnp.float32) * 0.1
        # PyTorch point_conv.weight is (D_out, D_in, 1) -> stored as (D_out, D_in).
        w_pw = jax.random.normal(k3, (D, D), dtype=jnp.float32) * 0.2
        b_pw = jax.random.normal(k4, (1, D), dtype=jnp.float32) * 0.1

        out = fused_dwpw_conv(x, w_dw, b_dw, w_pw, b_pw,
                              kernel_size=K, dilation=DIL, tile_l=TL)
        out = jax.block_until_ready(out)

        ref = _reference(x, w_dw, b_dw, w_pw, b_pw, K, DIL)
        # Tolerance covers the approx EUP reciprocal in SiLU (and, for bf16
        # configs, the bf16 output rounding); any indexing/causality bug would
        # produce O(0.1 - 1) errors.
        tol = 3e-2 if DT == jnp.bfloat16 else 5e-3
        np.testing.assert_allclose(
            np.asarray(jnp.asarray(out, dtype=jnp.float32)),
            np.asarray(ref), rtol=tol, atol=tol)

    print("KERNEL_OK")
</pallas_src>

<mosaic_0001>
module attributes {stable_mosaic.version = 11 : i64} {
  func.func @_fused_dwpw_kernel(%arg0: i32, %arg1: i32, %arg2: memref<4xi32, #tpu.memory_space<smem>>, %arg3: memref<1x16x128xf32, #tpu.memory_space<vmem>>, %arg4: memref<1x8x128xf32, #tpu.memory_space<vmem>>, %arg5: memref<3x128xf32, #tpu.memory_space<vmem>>, %arg6: memref<1x128xf32, #tpu.memory_space<vmem>>, %arg7: memref<128x128xbf16, #tpu.memory_space<vmem>>, %arg8: memref<1x128xf32, #tpu.memory_space<vmem>>, %arg9: memref<1x16x128xf32, #tpu.memory_space<vmem>>) attributes {dimension_semantics = [#tpu.dimension_semantics<parallel>, #tpu.dimension_semantics<parallel>], iteration_bounds = array<i64: 2, 4>, scalar_prefetch = 1 : i64, scratch_operands = 0 : i64, tpu.core_type = #tpu.core_type<tc>, window_params = [{transform_indices = @transform_0, window_bounds = array<i64: 1, 16, 128>}, {transform_indices = @transform_1, window_bounds = array<i64: 1, 8, 128>}, {pipeline_mode = #tpu.pipeline_mode<synchronous>, transform_indices = @transform_2, window_bounds = array<i64: 3, 128>}, {pipeline_mode = #tpu.pipeline_mode<synchronous>, transform_indices = @transform_3, window_bounds = array<i64: 1, 128>}, {pipeline_mode = #tpu.pipeline_mode<synchronous>, transform_indices = @transform_4, window_bounds = array<i64: 128, 128>}, {pipeline_mode = #tpu.pipeline_mode<synchronous>, transform_indices = @transform_5, window_bounds = array<i64: 1, 128>}, {transform_indices = @transform_6, window_bounds = array<i64: 1, 16, 128>}]} {
    %c0 = arith.constant 0 : index
    %c0_0 = arith.constant 0 : index
    %c0_1 = arith.constant 0 : index
    %0 = vector.load %arg3[%c0, %c0_0, %c0_1] : memref<1x16x128xf32, #tpu.memory_space<vmem>>, vector<1x16x128xf32>
    %1 = vector.shape_cast %0 : vector<1x16x128xf32> to vector<16x128xf32>
    %c0_2 = arith.constant 0 : index
    %c0_3 = arith.constant 0 : index
    %2 = vector.load %arg5[%c0_2, %c0_3] : memref<3x128xf32, #tpu.memory_space<vmem>>, vector<3x128xf32>
    %3 = vector.extract_strided_slice %2 {offsets = [2, 0], sizes = [1, 128], strides = [1, 1]} : vector<3x128xf32> to vector<1x128xf32>
    %4 = vector.shape_cast %3 : vector<1x128xf32> to vector<128xf32>
    %5 = vector.shape_cast %4 : vector<128xf32> to vector<1x128xf32>
    %6 = vector.broadcast %5 : vector<1x128xf32> to vector<16x128xf32>
    %7 = arith.mulf %1, %6 : vector<16x128xf32>
    %c0_i32 = arith.constant 0 : i32
    %8 = arith.cmpi sgt, %arg1, %c0_i32 : i32
    %9 = arith.extui %8 : i1 to i32
    %10 = arith.sitofp %9 : i32 to f32
    %c0_4 = arith.constant 0 : index
    %c0_5 = arith.constant 0 : index
    %c0_6 = arith.constant 0 : index
    %11 = vector.load %arg4[%c0_4, %c0_5, %c0_6] : memref<1x8x128xf32, #tpu.memory_space<vmem>>, vector<1x8x128xf32>
    %12 = vector.shape_cast %11 : vector<1x8x128xf32> to vector<8x128xf32>
    %13 = vector.broadcast %10 : f32 to vector<8x128xf32>
    %14 = arith.mulf %12, %13 : vector<8x128xf32>
    %15 = tpu.concatenate %14, %1 in 0 : vector<8x128xf32>, vector<16x128xf32> -> vector<24x128xf32>
    %16 = vector.extract_strided_slice %15 {offsets = [4, 0], sizes = [16, 128], strides = [1, 1]} : vector<24x128xf32> to vector<16x128xf32>
    %17 = vector.extract_strided_slice %2 {offsets = [0, 0], sizes = [1, 128], strides = [1, 1]} : vector<3x128xf32> to vector<1x128xf32>
    %18 = vector.shape_cast %17 : vector<1x128xf32> to vector<128xf32>
    %19 = vector.shape_cast %18 : vector<128xf32> to vector<1x128xf32>
    %20 = vector.broadcast %19 : vector<1x128xf32> to vector<16x128xf32>
    %21 = arith.mulf %16, %20 : vector<16x128xf32>
    %22 = arith.addf %7, %21 : vector<16x128xf32>
    %23 = vector.extract_strided_slice %15 {offsets = [6, 0], sizes = [16, 128], strides = [1, 1]} : vector<24x128xf32> to vector<16x128xf32>
    %24 = vector.extract_strided_slice %2 {offsets = [1, 0], sizes = [1, 128], strides = [1, 1]} : vector<3x128xf32> to vector<1x128xf32>
    %25 = vector.shape_cast %24 : vector<1x128xf32> to vector<128xf32>
    %26 = vector.shape_cast %25 : vector<128xf32> to vector<1x128xf32>
    %27 = vector.broadcast %26 : vector<1x128xf32> to vector<16x128xf32>
    %28 = arith.mulf %23, %27 : vector<16x128xf32>
    %29 = arith.addf %22, %28 : vector<16x128xf32>
    %c0_7 = arith.constant 0 : index
    %c0_8 = arith.constant 0 : index
    %30 = vector.load %arg6[%c0_7, %c0_8] : memref<1x128xf32, #tpu.memory_space<vmem>>, vector<1x128xf32>
    %31 = vector.broadcast %30 : vector<1x128xf32> to vector<16x128xf32>
    %32 = arith.addf %29, %31 : vector<16x128xf32>
    %33 = arith.truncf %32 : vector<16x128xf32> to vector<16x128xbf16>
    %c0_9 = arith.constant 0 : index
    %c0_10 = arith.constant 0 : index
    %34 = vector.load %arg7[%c0_9, %c0_10] : memref<128x128xbf16, #tpu.memory_space<vmem>>, vector<128x128xbf16>
    %cst = arith.constant dense<0.000000e+00> : vector<16x128xf32>
    %35 = tpu.matmul %33, %34, %cst {dimension_numbers = #tpu.dot_dimension_numbers<[1], [0], [0], [1], [0, 0, 1, 1], [], []>} : vector<16x128xbf16>, vector<128x128xbf16>, vector<16x128xf32> -> vector<16x128xf32>
    %c0_11 = arith.constant 0 : index
    %c0_12 = arith.constant 0 : index
    %36 = vector.load %arg8[%c0_11, %c0_12] : memref<1x128xf32, #tpu.memory_space<vmem>>, vector<1x128xf32>
    %37 = vector.broadcast %36 : vector<1x128xf32> to vector<16x128xf32>
    %38 = arith.addf %35, %37 : vector<16x128xf32>
    %cst_13 = arith.constant 0.000000e+00 : f32
    %39 = vector.broadcast %cst_13 : f32 to vector<16x128xf32>
    %40 = arith.subf %39, %38 : vector<16x128xf32>
    %41 = math.exp %40 : vector<16x128xf32>
    %cst_14 = arith.constant 1.000000e+00 : f32
    %42 = vector.broadcast %cst_14 : f32 to vector<16x128xf32>
    %43 = arith.addf %42, %41 : vector<16x128xf32>
    %44 = tpu.reciprocal %43 {approx = true} : vector<16x128xf32> -> vector<16x128xf32>
    %45 = arith.mulf %38, %44 : vector<16x128xf32>
    %c0_15 = arith.constant 0 : index
    %c0_16 = arith.constant 0 : index
    %c0_17 = arith.constant 0 : index
    %46 = vector.load %arg9[%c0_15, %c0_16, %c0_17] : memref<1x16x128xf32, #tpu.memory_space<vmem>>, vector<1x16x128xf32>
    %47 = vector.shape_cast %46 : vector<1x16x128xf32> to vector<16x128xf32>
    %48 = vector.shape_cast %45 : vector<16x128xf32> to vector<1x16x128xf32>
    tpu.vector_store %arg9[%c0_15, %c0_16, %c0_17], %48 {strides = array<i32>} : memref<1x16x128xf32, #tpu.memory_space<vmem>>, vector<1x16x128xf32>,
    return
  }
  func.func @transform_0(%arg0: i32, %arg1: i32, %arg2: memref<4xi32, #tpu.memory_space<smem>>) -> (i32, i32, i32) {
    %c0_i32 = arith.constant 0 : i32
    %c0_i32_0 = arith.constant 0 : i32
    return %arg0, %arg1, %c0_i32 : i32, i32, i32
  }
  func.func @transform_1(%arg0: i32, %arg1: i32, %arg2: memref<4xi32, #tpu.memory_space<smem>>) -> (i32, i32, i32) {
    %0 = arith.index_cast %arg1 : i32 to index
    %1 = memref.load %arg2[%0] : memref<4xi32, #tpu.memory_space<smem>>
    %c0_i32 = arith.constant 0 : i32
    %c0_i32_0 = arith.constant 0 : i32
    return %arg0, %1, %c0_i32 : i32, i32, i32
  }
  func.func @transform_2(%arg0: i32, %arg1: i32, %arg2: memref<4xi32, #tpu.memory_space<smem>>) -> (i32, i32) {
    %c0_i32 = arith.constant 0 : i32
    %c0_i32_0 = arith.constant 0 : i32
    %c0_i32_1 = arith.constant 0 : i32
    return %c0_i32, %c0_i32_0 : i32, i32
  }
  func.func @transform_3(%arg0: i32, %arg1: i32, %arg2: memref<4xi32, #tpu.memory_space<smem>>) -> (i32, i32) {
    %c0_i32 = arith.constant 0 : i32
    %c0_i32_0 = arith.constant 0 : i32
    %c0_i32_1 = arith.constant 0 : i32
    return %c0_i32, %c0_i32_0 : i32, i32
  }
  func.func @transform_4(%arg0: i32, %arg1: i32, %arg2: memref<4xi32, #tpu.memory_space<smem>>) -> (i32, i32) {
    %c0_i32 = arith.constant 0 : i32
    %c0_i32_0 = arith.constant 0 : i32
    %c0_i32_1 = arith.constant 0 : i32
    return %c0_i32, %c0_i32_0 : i32, i32
  }
  func.func @transform_5(%arg0: i32, %arg1: i32, %arg2: memref<4xi32, #tpu.memory_space<smem>>) -> (i32, i32) {
    %c0_i32 = arith.constant 0 : i32
    %c0_i32_0 = arith.constant 0 : i32
    %c0_i32_1 = arith.constant 0 : i32
    return %c0_i32, %c0_i32_0 : i32, i32
  }
  func.func @transform_6(%arg0: i32, %arg1: i32, %arg2: memref<4xi32, #tpu.memory_space<smem>>) -> (i32, i32, i32) {
    %c0_i32 = arith.constant 0 : i32
    %c0_i32_0 = arith.constant 0 : i32
    return %arg0, %arg1, %c0_i32 : i32, i32, i32
  }
}

module attributes {stable_mosaic.version = 11 : i64} {
  func.func @_fused_dwpw_kernel(%arg0: i32, %arg1: i32, %arg2: memref<4xi32, #tpu.memory_space<smem>>, %arg3: memref<1x16x128xf32, #tpu.memory_space<vmem>>, %arg4: memref<1x8x128xf32, #tpu.memory_space<vmem>>, %arg5: memref<3x128xf32, #tpu.memory_space<vmem>>, %arg6: memref<1x128xf32, #tpu.memory_space<vmem>>, %arg7: memref<128x128xbf16, #tpu.memory_space<vmem>>, %arg8: memref<1x128xf32, #tpu.memory_space<vmem>>, %arg9: memref<1x16x128xf32, #tpu.memory_space<vmem>>) attributes {dimension_semantics = [#tpu.dimension_semantics<parallel>, #tpu.dimension_semantics<parallel>], iteration_bounds = array<i64: 2, 4>, scalar_prefetch = 1 : i64, scratch_operands = 0 : i64, tpu.core_type = #tpu.core_type<tc>, window_params = [{transform_indices = @transform_0, window_bounds = array<i64: 1, 16, 128>}, {transform_indices = @transform_1, window_bounds = array<i64: 1, 8, 128>}, {pipeline_mode = #tpu.pipeline_mode<synchronous>, transform_indices = @transform_2, window_bounds = array<i64: 3, 128>}, {pipeline_mode = #tpu.pipeline_mode<synchronous>, transform_indices = @transform_3, window_bounds = array<i64: 1, 128>}, {pipeline_mode = #tpu.pipeline_mode<synchronous>, transform_indices = @transform_4, window_bounds = array<i64: 128, 128>}, {pipeline_mode = #tpu.pipeline_mode<synchronous>, transform_indices = @transform_5, window_bounds = array<i64: 1, 128>}, {transform_indices = @transform_6, window_bounds = array<i64: 1, 16, 128>}]} {
    %c0 = arith.constant 0 : index
    %c0_0 = arith.constant 0 : index
    %c0_1 = arith.constant 0 : index
    %0 = vector.load %arg3[%c0, %c0_0, %c0_1] : memref<1x16x128xf32, #tpu.memory_space<vmem>>, vector<1x16x128xf32>
    %1 = vector.shape_cast %0 : vector<1x16x128xf32> to vector<16x128xf32>
    %c0_2 = arith.constant 0 : index
    %c0_3 = arith.constant 0 : index
    %2 = vector.load %arg5[%c0_2, %c0_3] : memref<3x128xf32, #tpu.memory_space<vmem>>, vector<3x128xf32>
    %3 = vector.extract_strided_slice %2 {offsets = [2, 0], sizes = [1, 128], strides = [1, 1]} : vector<3x128xf32> to vector<1x128xf32>
    %4 = vector.shape_cast %3 : vector<1x128xf32> to vector<128xf32>
    %5 = vector.shape_cast %4 : vector<128xf32> to vector<1x128xf32>
    %6 = vector.broadcast %5 : vector<1x128xf32> to vector<16x128xf32>
    %7 = arith.mulf %1, %6 : vector<16x128xf32>
    %c0_i32 = arith.constant 0 : i32
    %8 = arith.cmpi sgt, %arg1, %c0_i32 : i32
    %9 = arith.extui %8 : i1 to i32
    %10 = arith.sitofp %9 : i32 to f32
    %c0_4 = arith.constant 0 : index
    %c0_5 = arith.constant 0 : index
    %c0_6 = arith.constant 0 : index
    %11 = vector.load %arg4[%c0_4, %c0_5, %c0_6] : memref<1x8x128xf32, #tpu.memory_space<vmem>>, vector<1x8x128xf32>
    %12 = vector.shape_cast %11 : vector<1x8x128xf32> to vector<8x128xf32>
    %13 = vector.broadcast %10 : f32 to vector<8x128xf32>
    %14 = arith.mulf %12, %13 : vector<8x128xf32>
    %15 = tpu.concatenate %14, %1 in 0 : vector<8x128xf32>, vector<16x128xf32> -> vector<24x128xf32>
    %16 = vector.extract_strided_slice %15 {offsets = [4, 0], sizes = [16, 128], strides = [1, 1]} : vector<24x128xf32> to vector<16x128xf32>
    %17 = vector.extract_strided_slice %2 {offsets = [0, 0], sizes = [1, 128], strides = [1, 1]} : vector<3x128xf32> to vector<1x128xf32>
    %18 = vector.shape_cast %17 : vector<1x128xf32> to vector<128xf32>
    %19 = vector.shape_cast %18 : vector<128xf32> to vector<1x128xf32>
    %20 = vector.broadcast %19 : vector<1x128xf32> to vector<16x128xf32>
    %21 = arith.mulf %16, %20 : vector<16x128xf32>
    %22 = arith.addf %7, %21 : vector<16x128xf32>
    %23 = vector.extract_strided_slice %15 {offsets = [6, 0], sizes = [16, 128], strides = [1, 1]} : vector<24x128xf32> to vector<16x128xf32>
    %24 = vector.extract_strided_slice %2 {offsets = [1, 0], sizes = [1, 128], strides = [1, 1]} : vector<3x128xf32> to vector<1x128xf32>
    %25 = vector.shape_cast %24 : vector<1x128xf32> to vector<128xf32>
    %26 = vector.shape_cast %25 : vector<128xf32> to vector<1x128xf32>
    %27 = vector.broadcast %26 : vector<1x128xf32> to vector<16x128xf32>
    %28 = arith.mulf %23, %27 : vector<16x128xf32>
    %29 = arith.addf %22, %28 : vector<16x128xf32>
    %c0_7 = arith.constant 0 : index
    %c0_8 = arith.constant 0 : index
    %30 = vector.load %arg6[%c0_7, %c0_8] : memref<1x128xf32, #tpu.memory_space<vmem>>, vector<1x128xf32>
    %31 = vector.broadcast %30 : vector<1x128xf32> to vector<16x128xf32>
    %32 = arith.addf %29, %31 : vector<16x128xf32>
    %33 = arith.truncf %32 : vector<16x128xf32> to vector<16x128xbf16>
    %c0_9 = arith.constant 0 : index
    %c0_10 = arith.constant 0 : index
    %34 = vector.load %arg7[%c0_9, %c0_10] : memref<128x128xbf16, #tpu.memory_space<vmem>>, vector<128x128xbf16>
    %cst = arith.constant dense<0.000000e+00> : vector<16x128xf32>
    %35 = tpu.matmul %33, %34, %cst {dimension_numbers = #tpu.dot_dimension_numbers<[1], [0], [0], [1], [0, 0, 1, 1], [], []>} : vector<16x128xbf16>, vector<128x128xbf16>, vector<16x128xf32> -> vector<16x128xf32>
    %c0_11 = arith.constant 0 : index
    %c0_12 = arith.constant 0 : index
    %36 = vector.load %arg8[%c0_11, %c0_12] : memref<1x128xf32, #tpu.memory_space<vmem>>, vector<1x128xf32>
    %37 = vector.broadcast %36 : vector<1x128xf32> to vector<16x128xf32>
    %38 = arith.addf %35, %37 : vector<16x128xf32>
    %cst_13 = arith.constant 0.000000e+00 : f32
    %39 = vector.broadcast %cst_13 : f32 to vector<16x128xf32>
    %40 = arith.subf %39, %38 : vector<16x128xf32>
    %41 = math.exp %40 : vector<16x128xf32>
    %cst_14 = arith.constant 1.000000e+00 : f32
    %42 = vector.broadcast %cst_14 : f32 to vector<16x128xf32>
    %43 = arith.addf %42, %41 : vector<16x128xf32>
    %44 = tpu.reciprocal %43 {approx = true} : vector<16x128xf32> -> vector<16x128xf32>
    %45 = arith.mulf %38, %44 : vector<16x128xf32>
    %c0_15 = arith.constant 0 : index
    %c0_16 = arith.constant 0 : index
    %c0_17 = arith.constant 0 : index
    %46 = vector.load %arg9[%c0_15, %c0_16, %c0_17] : memref<1x16x128xf32, #tpu.memory_space<vmem>>, vector<1x16x128xf32>
    %47 = vector.shape_cast %46 : vector<1x16x128xf32> to vector<16x128xf32>
    %48 = vector.shape_cast %45 : vector<16x128xf32> to vector<1x16x128xf32>
    tpu.vector_store %arg9[%c0_15, %c0_16, %c0_17], %48 {strides = array<i32>} : memref<1x16x128xf32, #tpu.memory_space<vmem>>, vector<1x16x128xf32>,
    return
  }
  func.func @transform_0(%arg0: i32, %arg1: i32, %arg2: memref<4xi32, #tpu.memory_space<smem>>) -> (i32, i32, i32) {
    %c0_i32 = arith.constant 0 : i32
    %c0_i32_0 = arith.constant 0 : i32
    return %arg0, %arg1, %c0_i32 : i32, i32, i32
  }
  func.func @transform_1(%arg0: i32, %arg1: i32, %arg2: memref<4xi32, #tpu.memory_space<smem>>) -> (i32, i32, i32) {
    %0 = arith.index_cast %arg1 : i32 to index
    %1 = memref.load %arg2[%0] : memref<4xi32, #tpu.memory_space<smem>>
    %c0_i32 = arith.constant 0 : i32
    %c0_i32_0 = arith.constant 0 : i32
    return %arg0, %1, %c0_i32 : i32, i32, i32
  }
  func.func @transform_2(%arg0: i32, %arg1: i32, %arg2: memref<4xi32, #tpu.memory_space<smem>>) -> (i32, i32) {
    %c0_i32 = arith.constant 0 : i32
    %c0_i32_0 = arith.constant 0 : i32
    %c0_i32_1 = arith.constant 0 : i32
    return %c0_i32, %c0_i32_0 : i32, i32
  }
  func.func @transform_3(%arg0: i32, %arg1: i32, %arg2: memref<4xi32, #tpu.memory_space<smem>>) -> (i32, i32) {
    %c0_i32 = arith.constant 0 : i32
    %c0_i32_0 = arith.constant 0 : i32
    %c0_i32_1 = arith.constant 0 : i32
    return %c0_i32, %c0_i32_0 : i32, i32
  }
  func.func @transform_4(%arg0: i32, %arg1: i32, %arg2: memref<4xi32, #tpu.memory_space<smem>>) -> (i32, i32) {
    %c0_i32 = arith.constant 0 : i32
    %c0_i32_0 = arith.constant 0 : i32
    %c0_i32_1 = arith.constant 0 : i32
    return %c0_i32, %c0_i32_0 : i32, i32
  }
  func.func @transform_5(%arg0: i32, %arg1: i32, %arg2: memref<4xi32, #tpu.memory_space<smem>>) -> (i32, i32) {
    %c0_i32 = arith.constant 0 : i32
    %c0_i32_0 = arith.constant 0 : i32
    %c0_i32_1 = arith.constant 0 : i32
    return %c0_i32, %c0_i32_0 : i32, i32
  }
  func.func @transform_6(%arg0: i32, %arg1: i32, %arg2: memref<4xi32, #tpu.memory_space<smem>>) -> (i32, i32, i32) {
    %c0_i32 = arith.constant 0 : i32
    %c0_i32_0 = arith.constant 0 : i32
    return %arg0, %arg1, %c0_i32 : i32, i32, i32
  }
}

</mosaic_0001>

<bundles_post_ra>
// kernel: tpu_custom_call.1
= control target key start
LH: loop header
LB: loop body
LE: loop exit
PB: predicated region body
PF: predicated region fallthrough
CT: control target
= control target key end

     0   :  { %s1164_s27 = smov [#allocation3]   ;;  %s1486_s0 = inlined_call_operand.hbm [shape: s32[4], index: 0, kind: input, shape index: {}]   ;;  %s1487_s1 = inlined_call_operand.hbm [shape: f32[2,64,128], index: 1, kind: input, shape index: {}]   ;;  %s1488_s2 = inlined_call_operand.hbm [shape: f32[2,64,128], index: 2, kind: input, shape index: {}]   ;;  %s1489_s3 = inlined_call_operand.hbm [shape: f32[3,128], index: 3, kind: input, shape index: {}]   ;;  %s1490_s4 = inlined_call_operand.vmem [shape: f32[1,128], index: 4, kind: input, shape index: {}]   ;;  %s1491_s5 = inlined_call_operand.hbm [shape: bf16[128,128], index: 5, kind: input, shape index: {}]   ;;  %s1492_s6 = inlined_call_operand.vmem [shape: f32[1,128], index: 6, kind: input, shape index: {}]   ;;  %s1493_s7 = inlined_call_operand.hbm [shape: f32[2,64,128], index: 7, kind: output, shape index: {}]  }
   0x1   :  { %1505 = sst [smem:[#allocation30_spill]] %s1487_s1  ;;  %s13_s26 = sshll.u32 %s1486_s0, 4  ;;  %s14_s26 = int_to_ptr.hbm [resolvable:$true] %s13_s26 }
   0x2   :  { %1506 = sst [smem:[#allocation31_spill]] %s1489_s3 }
   0x3   :  { %1507 = sst [smem:[#allocation32_spill]] %s1490_s4 }
   0x4   :  { %1508 = sst [smem:[#allocation33_spill]] %s1491_s5 }
   0x5   :  { %1509 = sst [smem:[#allocation34_spill]] %s1492_s6 }
   0x6   :  { %1510 = sst [smem:[#allocation35_spill]] %s1493_s7 }
   0x7   :  { %16 = dma.hbm_to_smem %s14_s26, 16, %s1164_s27, [#allocation2] }
   0x8   :  { %1098 = dma.done.wait [#allocation2], 16 }
   0x9   :  { %1099 = vsyncadd [#allocation2], 4294967280 }
   0xa   :  { %19 = sfence }
   0xb   :  { %20 = vsyncpa [#allocation5], 0 }
   0xc   :  { %22 = vsyncpa [#allocation5 + $0x1], 0 }
   0xd   :  { %23 = vsyncpa [#allocation8], 0 }
   0xe   :  { %25 = vsyncpa [#allocation8 + $0x1], 0 }
   0xf   :  { %26 = vsyncpa [#allocation11], 0 }
  0x10   :  { %27 = vsyncpa [#allocation6], 0 }
  0x11   :  { %29 = vsyncpa [#allocation6 + $0x1], 0  ;;  %s1216_s28 = smov 0   ;;  %s1218_s29 = smov 0  }
  0x12   :  { %s1220_s30 = smov 0   ;;  %s1222_s0 = smov 0  }
  0x13   :  { %s1224_s8 = smov 0   ;;  %s1226_s9 = smov 0  }
  0x14   :  { %s1228_s10 = smov 0   ;;  %s1230_s11 = smov 0  }
  0x15   :  { %s1232_s12 = smov 0   ;;  %s1234_s13 = smov 0  }
  0x16   :  { %s1236_s14 = smov 0  }
  0x17 LB: > { %1511 = sst [smem:[#allocation21_spill]] %s1134_s0  ;;  %s1270_s15 = sadd.s32 4294967295, %s1162_s14   ;;  %s1162_s14 = sphi %s1236_s14, %s35_s14   ;;  %s1158_s13 = sphi %s1234_s13, %s1554_s13   ;;  %s1154_s12 = sphi %s1232_s12, %s1546_s12   ;;  %s1150_s11 = sphi %s1230_s11, %s1553_s11   ;;  %s1146_s10 = sphi %s1228_s10, %s1545_s10   ;;  %s1142_s9 = sphi %s1226_s9, %s1544_s9   ;;  %s1138_s8 = sphi %s1224_s8, %s1552_s8   ;;  %s1134_s0 = sphi %s1222_s0, %s1551_s0   ;;  %s1130_s30 = sphi %s1220_s30, %s1550_s30   ;;  %s1126_s29 = sphi %s1218_s29, %s1549_s29   ;;  %s1122_s28 = sphi %s1216_s28, %s1548_s28  }
  0x18   : > { %1512 = sst [smem:[#allocation22_spill]] %s1142_s9  ;;  %s681_s16 = sadd.s32 4294967294, %s1162_s14  }
  0x19   : > { %1513 = sst [smem:[#allocation23_spill]] %s1150_s11  ;;  %p69_p0 = scmp.ne.s32.totalorder %s1138_s8, %s1134_s0 }
  0x1a   : > { %1514 = sst [smem:[#allocation24_spill]] %s1154_s12  ;;  %p1504_p1 = scmp.eq.s32.totalorder %s1270_s15, 0 }
  0x1b   : > { %p99_p2 = scmp.ne.s32.totalorder %s1126_s29, %s1122_s28  ;;  %p209_p3 = scmp.eq.s32.totalorder %s1270_s15, 7 }
  0x1c   : > { %p1280_p4 = por %p1504_p1, %p69_p0  ;;  %p215_p5 = scmp.eq.s32.totalorder %s681_s16, 7 }
  0x1d   : > { %p1286_p6 = por %p99_p2, %p1504_p1  ;;  %p682_p7 = scmp.ge.s32.totalorder %s1162_s14, 1 }
  0x1e   : > { %p1291_p8 = por %p215_p5, %p69_p0  ;;  %p222_p9 = scmp.lt.s32.totalorder %s1162_s14, 9 }
  0x1f   : > { %s1519_s3 = sld [smem:[#allocation31_spill]]  ;;  %s1165_s24 = smov [#allocation9]  }
  0x20   : > { %s1517_s19 = scalar_select %p1291_p8, 1, 0 }
  0x21   : > { %p1299_p10 = pnand %p682_p7, %p222_p9  ;;  %s236_s25 = sshll.u32 %s1165_s24, 4  ;;  %s237_s25 = int_to_ptr.vmem [resolvable:$true] %s236_s25 }
  0x22   : > { %1518 = sst [smem:[#allocation25_spill]] %s1517_s19  ;;  %s1166_s16 = smov [#allocation10]  }
  0x23   : > { %p761_p11 = pneg %p1299_p10  ;;  %s1521_s5 = sld [smem:[#allocation33_spill]] }
  0x24   : > { %s250_s20 = sshll.u32 %s1166_s16, 4  ;;  %s1167_s21 = smov 64   ;;  %s251_s20 = int_to_ptr.vmem [resolvable:$true] %s250_s20 }
  0x25   : > { %s234_s22 = sshll.u32 %s1519_s3, 4  ;;  %p762_p12 = pnand %p761_p11, %p1504_p1  ;;  %s235_s22 = int_to_ptr.hbm [resolvable:$true] %s234_s22 }
  0x26   : > { %s1168_s24 = smov 4   ;;  %s44_s3 = sadd.s32 1, %s1154_s12 }
  0x27   : > { %764 = dma.hbm_to_vmem [thread:$0]  (!%p762_p12), %s235_s22, 64, %s237_s25, [#allocation8]  }
  0x28   : > { %s47_s26 = sadd.s32 1, %s1158_s13  ;;  %p45_p13 = scmp.ge.s32.totalorder %s44_s3, 4 }
  0x29   : > { %s248_s28 = sshll.u32 %s1521_s5, 4  ;;  %s56_s27 = sadd.s32 1, %s1142_s9  ;;  %s249_s28 = int_to_ptr.hbm [resolvable:$true] %s248_s28 }
  0x2a   : > { %767 = dma.hbm_to_vmem [thread:$0]  (!%p762_p12), %s249_s28, 1024, %s251_s20, [#allocation11], %s1167_s21, %s1167_s21, %s1168_s24  }
  0x2b   : > { %p63_p0 = scmp.ne.s32.totalorder %s1142_s9, %s1138_s8  ;;  %p64_p2 = scmp.eq.s32.totalorder %s1162_s14, 0 }
  0x2c   : > { %s1556_s3 = smov (%p45_p13, %s44_s3), 0  ;;  %s1558_s26 = smov (!%p45_p13, %s47_s26), %s1158_s13 }
  0x2d   : > { %1522 = sst [smem:[#allocation26_spill]] %s1556_s3  ;;  %s52_s22 = ssub.s32 %s1154_s12, %s1556_s3 }
  0x2e   : > { %p1323_p5 = por %p64_p2, %p63_p0  ;;  %p49_p7 = scmp.ge.s32.totalorder %s1558_s26, 2 }
  0x2f   : > { %s1328_s28 = sld [smem:[#allocation3 + %s1154_s12]]  ;;  %p1335_p9 = por %p209_p3, %p63_p0 }
  0x30   : > { %s1331_s16 = sld [smem:[#allocation3 + %s1556_s3]]  ;;  %s1560_s26 = smov (%p49_p7, %s1558_s26), 0 }
  0x31   : > { %s1524_s20 = scalar_select %p1335_p9, 1, 0 }
  0x32   : > { %1526 = sst [smem:[#allocation28_spill]] %s1560_s26  ;;  %p783_p11 = scmp.lt.s32.totalorder %s1162_s14, 8 }
  0x33   : > { %1525 = sst [smem:[#allocation27_spill]] %s1524_s20  ;;  %s267_s21 = sand.u32 1, %s1142_s9  }
  0x34   : > { %s51_s24 = ssub.s32 %s1158_s13, %s1560_s26  ;;  %s686_s19 = sshll.u32 %s267_s21, 4 }
  0x35   : > { %s53_s5 = sor.u32 %s52_s22, %s51_s24  ;;  %s687_s0 = sshll.u32 %s1154_s12, 1 }
  0x36   : > { %p54_p12 = scmp.eq.s32.totalorder %s53_s5, 0  ;;  %s1501_s3 = sshll.u32 %s1158_s13, 3 }
  0x37   : > { %s276_s20 = sadd.s32 %s1501_s3, %s687_s0  ;;  %s271_s6 = scalar_lea.vmem [#allocation4], %s686_s19 }
  0x38   : > { %s1348_s7 = scalar_select %p54_p12, %s1142_s9, %s56_s27  }
  0x39   : > { %s281_s11 = sshll.u32 %s271_s6, 4  ;;  %s689_s4 = sshll.u32 %s276_s20, 3  ;;  %s282_s11 = int_to_ptr.vmem [resolvable:$true] %s281_s11 }
  0x3a   : > { %1527 = sst [smem:[#allocation29_spill]] %s1348_s7  ;;  %p769_p3 = pnand %p783_p11, %p1323_p5 }
  0x3b   : > { %s1528_s1 = sld [smem:[#allocation30_spill]]  ;;  %s268_s0 = scalar_lea.sflag [#allocation5], %s267_s21 }
  0x3c   : > { %s1169_s6 = smov 128   ;;  %s1170_s19 = smov 8  }
  0x3d   : > { %s82_s20 = ssub.s32 %s1328_s28, %s1331_s16  ;;  %s86_s7 = sadd.s32 1, %s1130_s30 }
  0x3e   : > { %s83_s3 = sor.u32 %s82_s20, %s51_s24  ;;  %p93_p0 = scmp.ne.s32.totalorder %s1130_s30, %s1126_s29 }
  0x3f   : > { %p84_p13 = scmp.eq.s32.totalorder %s83_s3, 0  ;;  %s293_s26 = sand.u32 1, %s1130_s30  }
  0x40   : > { %p95_p5 = por %p93_p0, %p64_p2  ;;  %s291_s28 = sand.u32 1, %s1162_s14  }
  0x41   : > { %s278_s5 = scalar_lea.hbm %s1528_s1, %s689_s4  ;;  %s1530_s24 = sshll.u32 %s1158_s13, 3 }
  0x42   : > { %s279_s27 = sshll.u32 %s278_s5, 4  ;;  %p1372_p7 = pnand %p783_p11, %p95_p5  ;;  %s280_s27 = int_to_ptr.hbm [resolvable:$true] %s279_s27 }
  0x43   : > { %771 = dma.hbm_to_vmem [thread:$0]  (!%p769_p3), %s280_s27, 256, %s282_s11, %s268_s0, %s1169_s6, %s1169_s6, %s1170_s19  }
  0x44   : > { %s1365_s4 = scalar_select %p84_p13, %s1130_s30, %s86_s7  }
  0x45   : > { %s750_s21 = scalar_select %p95_p5, [#allocation3], [#allocation13] }
  0x46   : > { %s751_s22 = scalar_select %p95_p5, %s1154_s12, 0 }
  0x47   : > { %s1562_s21 = smov (!%p783_p11, %s750_s21), [#allocation14]  ;;  %s690_s11 = sshll.u32 %s293_s26, 3 }
  0x48   : > { %s1564_s22 = smov (!%p783_p11, %s751_s22), 0  ;;  %s295_s7 = scalar_lea.vmem [#allocation7], %s690_s11 }
  0x49   : > { %s296_s3 = sld [smem:[%s1562_s21 + %s1564_s22]]  ;;  %s306_s16 = sshll.u32 %s295_s7, 4  ;;  %s307_s16 = int_to_ptr.vmem [resolvable:$true] %s306_s16 }
  0x4a   : > { %s292_s1 = scalar_lea.sflag [#allocation8], %s291_s28  ;;  %p1000_p11 = pneg %p1372_p7 }
  0x4b   : > { %s1003_s22 = scalar_lea.hbm %s1488_s2, 128 }
  0x4f   : > { %s300_s5 = sadd.s32 %s1530_s24, %s296_s3 }
  0x50   : > { %s692_s27 = sshll.u32 %s300_s5, 3 }
  0x51   : > { %s302_s19 = scalar_lea.hbm %s1488_s2, %s692_s27 }
  0x52   : > { %s304_s20 = sshll.u32 %s302_s19, 4  ;;  %s305_s20 = int_to_ptr.hbm [resolvable:$true] %s304_s20 }
  0x53   : > { %s996_s12 = sshra.s32 %s305_s20, 4  ;;  %s997_s12 = int_to_ptr.hbm [resolvable:$true] %s996_s12 }
  0x54   : > { %s998_s9 = scalar_lea.hbm %s997_s12, 8  ;;  %p1004_p13 = scmp.lt.s32.totalorder %s997_s12, %s1488_s2 }
  0x55   : > { %p999_p2 = scmp.ne.s32.totalorder %s997_s12, %s998_s9  ;;  %p1005_p0 = scmp.lt.s32.totalorder %s1003_s22, %s998_s9 }
  0x57   : > { %p1001_p12 = pnand %p1000_p11, %p999_p2  ;;  %p1006_p5 = por %p1005_p0, %p1004_p13 }
  0x59   : > { %p1002_p3 = pneg %p1001_p12 }
  0x5b   : > { %p1007_p1 = pnand %p1006_p5, %p1002_p3 }
  0x5d   : > { %1010 = shalt.err (!%p1007_p1)
}
  0x5e   : > { %776 = dma.hbm_to_vmem [thread:$0]  (!%p1372_p7), %s305_s20, 128, %s307_s16, %s292_s1  }
  0x5f   : > { %315 = sbr.rel (%p1299_p10) target bundleno = 305 (0x131), region = 44  ;;  %s1400_s28 = sand.u32 (!%p1299_p10), 1, %s1138_s8  }
  0x60   : > { %s694_s7 = sshll.u32 (!%p1299_p10), %s1400_s28, 4  ;;  %s318_s24 = scalar_lea.sflag (!%p1299_p10), [#allocation5], %s1400_s28 }
  0x61   : > { %s321_s9 = scalar_lea.vmem (!%p1299_p10), [#allocation4], %s694_s7 }
  0x64   : > { %1101 = dma.done.wait (%p1280_p4), %s318_s24, 256  }
  0x65   : > { %1103 = vsyncadd (%p1280_p4), %s318_s24, 4294967040  ;;  %s327_s1 = sand.u32 1, %s1270_s15   ;;  %s329_s12 = sand.u32 1, %s1126_s29  }
  0x66   : > { %s695_s23 = sshll.u32 %s329_s12, 3  ;;  %s328_s25 = scalar_lea.sflag [#allocation8], %s327_s1 }
  0x67   : > { %s331_s16 = scalar_lea.vmem [#allocation7], %s695_s23 }
  0x68   : > { %1105 = dma.done.wait (%p1286_p6), %s328_s25, 128  }
  0x69   : > { %1107 = vsyncadd (%p1286_p6), %s328_s25, 4294967168  ;;  %p1531_p1 = scmp.eq.s32.totalorder %s1270_s15, 0 }
  0x6b   : > { %1109 = dma.done.wait (%p1531_p1), [#allocation8], 64   ;;  %p1532_p10 = pmov %p1531_p1 }
  0x6c   : > { %p1533_p4 = pmov %p1531_p1 }
  0x6d   : > { %1111 = vsyncadd (%p1532_p10), [#allocation8], 4294967232 }
  0x6e   : > { %1113 = dma.done.wait (%p1533_p4), [#allocation11], 1024   ;;  %p1534_p7 = pmov %p1531_p1 }
  0x6f   : > { %p385_p2 = scmp.gt.s32.totalorder %s1146_s10, 0  ;;  %v744_v0 = vld [vmem:[#allocation10 + $0x38] sm:$0xff]  ;;  %v743_v2 = vld [vmem:[#allocation10 + $0x30] sm:$0xff]  ;;  %v742_v10 = vld [vmem:[#allocation10 + $0x28] sm:$0xff]  ;;  %vm398_vm0 = vcmask 1043456   ;;  %vm415_vm1 = vcmask 1041408  }
  0x70   : > { %1115 = vsyncadd (%p1534_p7), [#allocation11], 4294966272  ;;  %500 = vmatpush.bf16.msra.mxu0 %v744_v0  ;;  %v379_v3 = vld [vmem:[%s321_s9] sm:$0xff]  ;;  %v380_v6 = vld [vmem:[%s321_s9 + $0x8] sm:$0xff]  ;;  %s1535_s27 = sld [smem:[#allocation32_spill]]  ;;  %s732_s26 = sshll.u32 %s1146_s10, 1 }
  0x71   : > { %s386_s17 = scalar_select %p385_p2, 1, 0  ;;  %v381_v4 = vld [vmem:[#allocation9] sm:$0x7]  ;;  %v388_v5 = vld [vmem:[%s331_s16] sm:$0xff]  ;;  %v741_v17 = vld [vmem:[#allocation10 + $0x20] sm:$0xff] }
  0x72   : > { %v391_v8 = vperm.slane %v381_v4, 0  ;;  %v408_v9 = vperm.slane %v381_v4, 1  ;;  %v382_v14 = vperm.slane %v381_v4, 2  ;;  %v740_v25 = vld [vmem:[#allocation10 + $0x18] sm:$0xff]  ;;  %v739_v32 = vld [vmem:[#allocation10 + $0x10] sm:$0xff]  ;;  %v738_v38 = vld [vmem:[#allocation10 + $0x8] sm:$0xff] }
  0x73   : > { %s387_s5 = scvt.s32.f32 %s386_s17  ;;  %v737_v41 = vld [vmem:[#allocation10] sm:$0xff]  ;;  %s1536_s0 = sld [smem:[#allocation23_spill]] }
  0x74   : > { %501 = vmatpush.bf16.msra.mxu0 %v743_v2  ;;  %v393_v12 = vmul.f32 %v391_v8, %v379_v3  ;;  %v394_v13 = vmul.f32 %v391_v8, %v380_v6  ;;  %v410_v16 = vmul.f32 %v408_v9, %v379_v3  ;;  %v411_v21 = vmul.f32 %v408_v9, %v380_v6  ;;  %s1537_s20 = sld [smem:[#allocation34_spill]]  ;;  %s375_s25 = scalar_lea.vmem [#allocation12], %s694_s7 }
  0x75   : > { %v389_v1 = vstv %s387_s5  ;;  %v383_v22 = vmul.f32 %v382_v14, %v379_v3  ;;  %v384_v23 = vmul.f32 %v382_v14, %v380_v6  ;;  %s1538_s9 = sld [smem:[#allocation35_spill]]  ;;  %s543_s16 = sshll.u32 %s375_s25, 4  ;;  %s544_s16 = int_to_ptr.vmem [resolvable:$true] %s543_s16 }
  0x76   : > { %v390_v7 = vmul.f32 %v389_v1, %v388_v5  ;;  %v400_v19 = vrot.slane %v393_v12, 4  ;;  %v402_v20 = vrot.slane %v394_v13, 4  ;;  %v417_v28 = vrot.slane %v410_v16, 6  ;;  %v884_v37 = vld [vmem:[%s1535_s27] ss:$0 sm:$0xff]  ;;  %s529_s17 = scalar_lea.sflag [#allocation6], %s1400_s28 }
  0x77   : > { %v419_v29 = vrot.slane %v411_v21, 6 }
  0x78   : > { %v392_v11 = vmul.f32 %v391_v8, %v390_v7  ;;  %v409_v15 = vmul.f32 %v408_v9, %v390_v7  ;;  %502 = vmatpush.bf16.msra.mxu0 %v742_v10  ;;  %v403_v27 = vsel %vm398_vm0, %v400_v19, %v402_v20 }
  0x79   : > { %v407_v31 = vadd.f32 %v403_v27, %v384_v23  ;;  %v420_v34 = vsel %vm415_vm1, %v417_v28, %v419_v29  ;;  %s733_s21 = sshll.u32 %s1536_s0, 3 }
  0x7a   : > { %v399_v18 = vrot.slane %v392_v11, 4  ;;  %v416_v24 = vrot.slane %v409_v15, 6  ;;  %v885_v43 = vld [vmem:[%s1537_s20] ss:$0 sm:$0xff]  ;;  %s540_s22 = sadd.s32 %s733_s21, %s732_s26 }
  0x7b   : > { %v424_v36 = vadd.f32 %v420_v34, %v407_v31  ;;  %s734_s11 = sshll.u32 %s540_s22, 3  ;;  %s1539_s1 = smov %s1538_s9 }
  0x7c   : > { %503 = vmatpush.bf16.msra.mxu0 %v741_v17  ;;  %v401_v26 = vsel %vm398_vm0, %v399_v18, %v400_v19  ;;  %v418_v33 = vsel %vm415_vm1, %v416_v24, %v417_v28  ;;  %s542_s23 = scalar_lea.hbm %s1538_s9, %s734_s11  ;;  %s1046_s7 = scalar_lea.hbm %s1539_s1, 128 }
  0x7d   : > { %v406_v30 = vadd.f32 %v401_v26, %v383_v22  ;;  %v430_v40 = vadd.f32 %v884_v37, %v424_v36  ;;  %s545_s10 = sshll.u32 %s542_s23, 4  ;;  %s546_s10 = int_to_ptr.hbm [resolvable:$true] %s545_s10 }
  0x7e   : > { %s1040_s5 = sshra.s32 %s546_s10, 4  ;;  %s1041_s5 = int_to_ptr.hbm [resolvable:$true] %s1040_s5 }
  0x7f   : > { %v423_v35 = vadd.f32 %v418_v33, %v406_v30  ;;  %s1042_s15 = scalar_lea.hbm %s1041_s5, 16  ;;  %p1047_p3 = scmp.lt.s32.totalorder %s1041_s5, %s1539_s1 }
  0x80   : > { %504 = vmatpush.bf16.msra.mxu0 %v740_v25  ;;  %p1043_p6 = scmp.ne.s32.totalorder %s1041_s5, %s1042_s15  ;;  %p1048_p13 = scmp.lt.s32.totalorder %s1046_s7, %s1042_s15 }
  0x81   : > { %v429_v39 = vadd.f32 %v884_v37, %v423_v35 }
  0x82   : > { %p1044_p11 = pnand %p1043_p6, %p1335_p9  ;;  %p1049_p0 = por %p1048_p13, %p1047_p3 }
  0x83   : > { %v431_v42 = vpack.c.bf16 %v430_v40, %v429_v39 }
  0x84   : > { %505 = vmatpush.bf16.msra.mxu0 %v739_v32  ;;  %p1045_p12 = pneg %p1044_p11 }
  0x86   : > { %p1050_p5 = pnand %p1049_p0, %p1045_p12 }
  0x88   : > { %506 = vmatpush.bf16.msra.mxu0 %v738_v38 }
  0x8c   : > { %507 = vmatpush.bf16.msra.mxu0 %v737_v41 }
  0x8f   : > { %508 = vmatmul.bf16.vlgmr.msra.gmra.mxu0 %v431_v42 }
 0x10c   : > { %v509_v44 = vpop.f32.mrf.mxu0 }
 0x10d   : > { %v510_v45 = vadd.f32 %v885_v43, %v509_v44 }
 0x10f   : > { %v514_v46 = vsub.f32 0.0, %v510_v45 }
 0x111   : > { %v516_v47 = vmul.f32 1.442695, %v514_v46 }
 0x113   : > { %886 = vpow2.f32 %v516_v47 }
 0x114   : > { %v511_v48 = vpop.f32.mrf.mxu0 }
 0x115   : > { %v512_v49 = vadd.f32 %v885_v43, %v511_v48 }
 0x117   : > { %v515_v50 = vsub.f32 0.0, %v512_v49 }
 0x119   : > { %v887_v51 = vpop.eup %886  ;;  %v518_v52 = vmul.f32 1.442695, %v515_v50 }
 0x11a   : > { %v520_v53 = vadd.f32 1.0, %v887_v51 }
 0x11b   : > { %888 = vpow2.f32 %v518_v52 }
 0x11c   : > { %890 = vrcp.f32 %v520_v53 }
 0x121   : > { %v889_v54 = vpop.eup %888 }
 0x122   : > { %v891_v55 = vpop.eup %890  ;;  %v521_v56 = vadd.f32 1.0, %v889_v54 }
 0x123   : > { %v524_v57 = vmul.f32 %v891_v55, %v510_v45 }
 0x124   : > { %892 = vrcp.f32 %v521_v56 }
 0x125   : > { %526 = vst [vmem:[%s375_s25] sm:$0xff] %v524_v57 }
 0x12a   : > { %v893_v58 = vpop.eup %892 }
 0x12b   : > { %v525_v59 = vmul.f32 %v893_v58, %v512_v49 }
 0x12d   : > { %527 = vst [vmem:[%s375_s25 + $0x8] sm:$0xff] %v525_v59 }
 0x12e   : > { %1053 = shalt.err (!%p1050_p5)
}
 0x12f   : > { %s1171_s28 = smov 128   ;;  %s1172_s19 = smov 8  }
 0x130   : > { %759 = dma.vmem_to_hbm [thread:$0]  (%p1335_p9), %s544_s16, 256, %s546_s10, %s529_s17, %s1171_s28, %s1171_s28, %s1172_s19  }
 0x131 PF: > { %s1541_s20 = sld [smem:[#allocation21_spill]]  ;;  %p786_p1 = scmp.ge.s32.totalorder %s1162_s14, 2 }
 0x133   : > { %p778_p10 = pnand %p786_p1, %p1291_p8 }
 0x135   : > { %p779_p4 = pneg %p778_p10 }
 0x137   : > { %s560_s21 = sand.u32 1, %s1541_s20  }
 0x138   : > { %s561_s22 = scalar_lea.sflag [#allocation6], %s560_s21 }
 0x139   : > { %1117 = dma.done.wait (%p779_p4), %s561_s22, 256  }
 0x13a   : > { %1119 = vsyncadd (%p779_p4), %s561_s22, 4294967040  ;;  %s35_s14 = sadd.s32 1, %s1162_s14   ;;  %s1543_s11 = sld [smem:[#allocation22_spill]] }
 0x13b   : > { %p32_p7 = scmp.ge.s32.totalorder %s35_s14, 10   ;;  %s1544_s9 = sld [smem:[#allocation29_spill]] }
 0x13c   : > { %s1545_s10 = sld [smem:[#allocation24_spill]]  ;;  %s1548_s28 = smov %s1126_s29 }
 0x13d   : > { %s1546_s12 = sld [smem:[#allocation26_spill]]  ;;  %s1549_s29 = smov %s1130_s30 }
 0x13e   : > { %s1547_s3 = sld [smem:[#allocation28_spill]]  ;;  %s1550_s30 = smov %s1365_s4 }
 0x13f   : > { %s1551_s0 = smov %s1138_s8 }
 0x140   : > { %s1552_s8 = smov %s1543_s11  ;;  %s1553_s11 = smov %s1158_s13 }
 0x141   :  { %34 = sbr.rel (!%p32_p7) target bundleno = 23 (0x17), region = 110 }
 0x144   : > { %s1554_s13 = smov %s1547_s3 }
 0x146   :  { %567 = vsyncpa [#allocation5], 1 }
 0x147   :  { %569 = vsyncpa [#allocation5 + $0x1], 1 }
 0x148   :  { %570 = vsyncpa [#allocation8], 1 }
 0x149   :  { %572 = vsyncpa [#allocation8 + $0x1], 1 }
 0x14a   :  { %573 = vsyncpa [#allocation11], 1 }
 0x14b   :  { %574 = vsyncpa [#allocation6], 1 }
 0x14c   :  { %576 = vsyncpa [#allocation6 + $0x1], 1 }

// kernel: tpu_custom_call.1
= control target key start
LH: loop header
LB: loop body
LE: loop exit
PB: predicated region body
PF: predicated region fallthrough
CT: control target
= control target key end

     0   :  { %s1164_s27 = smov [#allocation3]   ;;  %s1486_s0 = inlined_call_operand.hbm [shape: s32[4], index: 0, kind: input, shape index: {}]   ;;  %s1487_s1 = inlined_call_operand.hbm [shape: f32[2,64,128], index: 1, kind: input, shape index: {}]   ;;  %s1488_s2 = inlined_call_operand.hbm [shape: f32[2,64,128], index: 2, kind: input, shape index: {}]   ;;  %s1489_s3 = inlined_call_operand.hbm [shape: f32[3,128], index: 3, kind: input, shape index: {}]   ;;  %s1490_s4 = inlined_call_operand.vmem [shape: f32[1,128], index: 4, kind: input, shape index: {}]   ;;  %s1491_s5 = inlined_call_operand.hbm [shape: bf16[128,128], index: 5, kind: input, shape index: {}]   ;;  %s1492_s6 = inlined_call_operand.vmem [shape: f32[1,128], index: 6, kind: input, shape index: {}]   ;;  %s1493_s7 = inlined_call_operand.hbm [shape: f32[2,64,128], index: 7, kind: output, shape index: {}]  }
   0x1   :  { %1505 = sst [smem:[#allocation30_spill]] %s1487_s1  ;;  %s13_s26 = sshll.u32 %s1486_s0, 4  ;;  %s14_s26 = int_to_ptr.hbm [resolvable:$true] %s13_s26 }
   0x2   :  { %1506 = sst [smem:[#allocation31_spill]] %s1489_s3 }
   0x3   :  { %1507 = sst [smem:[#allocation32_spill]] %s1490_s4 }
   0x4   :  { %1508 = sst [smem:[#allocation33_spill]] %s1491_s5 }
   0x5   :  { %1509 = sst [smem:[#allocation34_spill]] %s1492_s6 }
   0x6   :  { %1510 = sst [smem:[#allocation35_spill]] %s1493_s7 }
   0x7   :  { %16 = dma.hbm_to_smem %s14_s26, 16, %s1164_s27, [#allocation2] }
   0x8   :  { %1098 = dma.done.wait [#allocation2], 16 }
   0x9   :  { %1099 = vsyncadd [#allocation2], 4294967280 }
   0xa   :  { %19 = sfence }
   0xb   :  { %20 = vsyncpa [#allocation5], 0 }
   0xc   :  { %22 = vsyncpa [#allocation5 + $0x1], 0 }
   0xd   :  { %23 = vsyncpa [#allocation8], 0 }
   0xe   :  { %25 = vsyncpa [#allocation8 + $0x1], 0 }
   0xf   :  { %26 = vsyncpa [#allocation11], 0 }
  0x10   :  { %27 = vsyncpa [#allocation6], 0 }
  0x11   :  { %29 = vsyncpa [#allocation6 + $0x1], 0  ;;  %s1216_s28 = smov 0   ;;  %s1218_s29 = smov 0  }
  0x12   :  { %s1220_s30 = smov 0   ;;  %s1222_s0 = smov 0  }
  0x13   :  { %s1224_s8 = smov 0   ;;  %s1226_s9 = smov 0  }
  0x14   :  { %s1228_s10 = smov 0   ;;  %s1230_s11 = smov 0  }
  0x15   :  { %s1232_s12 = smov 0   ;;  %s1234_s13 = smov 0  }
  0x16   :  { %s1236_s14 = smov 0  }
  0x17 LB: > { %1511 = sst [smem:[#allocation21_spill]] %s1134_s0  ;;  %s1270_s15 = sadd.s32 4294967295, %s1162_s14   ;;  %s1162_s14 = sphi %s1236_s14, %s35_s14   ;;  %s1158_s13 = sphi %s1234_s13, %s1554_s13   ;;  %s1154_s12 = sphi %s1232_s12, %s1546_s12   ;;  %s1150_s11 = sphi %s1230_s11, %s1553_s11   ;;  %s1146_s10 = sphi %s1228_s10, %s1545_s10   ;;  %s1142_s9 = sphi %s1226_s9, %s1544_s9   ;;  %s1138_s8 = sphi %s1224_s8, %s1552_s8   ;;  %s1134_s0 = sphi %s1222_s0, %s1551_s0   ;;  %s1130_s30 = sphi %s1220_s30, %s1550_s30   ;;  %s1126_s29 = sphi %s1218_s29, %s1549_s29   ;;  %s1122_s28 = sphi %s1216_s28, %s1548_s28  }
  0x18   : > { %1512 = sst [smem:[#allocation22_spill]] %s1142_s9  ;;  %s681_s16 = sadd.s32 4294967294, %s1162_s14  }
  0x19   : > { %1513 = sst [smem:[#allocation23_spill]] %s1150_s11  ;;  %p69_p0 = scmp.ne.s32.totalorder %s1138_s8, %s1134_s0 }
  0x1a   : > { %1514 = sst [smem:[#allocation24_spill]] %s1154_s12  ;;  %p1504_p1 = scmp.eq.s32.totalorder %s1270_s15, 0 }
  0x1b   : > { %p99_p2 = scmp.ne.s32.totalorder %s1126_s29, %s1122_s28  ;;  %p209_p3 = scmp.eq.s32.totalorder %s1270_s15, 7 }
  0x1c   : > { %p1280_p4 = por %p1504_p1, %p69_p0  ;;  %p215_p5 = scmp.eq.s32.totalorder %s681_s16, 7 }
  0x1d   : > { %p1286_p6 = por %p99_p2, %p1504_p1  ;;  %p682_p7 = scmp.ge.s32.totalorder %s1162_s14, 1 }
  0x1e   : > { %p1291_p8 = por %p215_p5, %p69_p0  ;;  %p222_p9 = scmp.lt.s32.totalorder %s1162_s14, 9 }
  0x1f   : > { %s1519_s3 = sld [smem:[#allocation31_spill]]  ;;  %s1165_s24 = smov [#allocation9]  }
  0x20   : > { %s1517_s19 = scalar_select %p1291_p8, 1, 0 }
  0x21   : > { %p1299_p10 = pnand %p682_p7, %p222_p9  ;;  %s236_s25 = sshll.u32 %s1165_s24, 4  ;;  %s237_s25 = int_to_ptr.vmem [resolvable:$true] %s236_s25 }
  0x22   : > { %1518 = sst [smem:[#allocation25_spill]] %s1517_s19  ;;  %s1166_s16 = smov [#allocation10]  }
  0x23   : > { %p761_p11 = pneg %p1299_p10  ;;  %s1521_s5 = sld [smem:[#allocation33_spill]] }
  0x24   : > { %s250_s20 = sshll.u32 %s1166_s16, 4  ;;  %s1167_s21 = smov 64   ;;  %s251_s20 = int_to_ptr.vmem [resolvable:$true] %s250_s20 }
  0x25   : > { %s234_s22 = sshll.u32 %s1519_s3, 4  ;;  %p762_p12 = pnand %p761_p11, %p1504_p1  ;;  %s235_s22 = int_to_ptr.hbm [resolvable:$true] %s234_s22 }
  0x26   : > { %s1168_s24 = smov 4   ;;  %s44_s3 = sadd.s32 1, %s1154_s12 }
  0x27   : > { %764 = dma.hbm_to_vmem [thread:$0]  (!%p762_p12), %s235_s22, 64, %s237_s25, [#allocation8]  }
  0x28   : > { %s47_s26 = sadd.s32 1, %s1158_s13  ;;  %p45_p13 = scmp.ge.s32.totalorder %s44_s3, 4 }
  0x29   : > { %s248_s28 = sshll.u32 %s1521_s5, 4  ;;  %s56_s27 = sadd.s32 1, %s1142_s9  ;;  %s249_s28 = int_to_ptr.hbm [resolvable:$true] %s248_s28 }
  0x2a   : > { %767 = dma.hbm_to_vmem [thread:$0]  (!%p762_p12), %s249_s28, 1024, %s251_s20, [#allocation11], %s1167_s21, %s1167_s21, %s1168_s24  }
  0x2b   : > { %p63_p0 = scmp.ne.s32.totalorder %s1142_s9, %s1138_s8  ;;  %p64_p2 = scmp.eq.s32.totalorder %s1162_s14, 0 }
  0x2c   : > { %s1556_s3 = smov (%p45_p13, %s44_s3), 0  ;;  %s1558_s26 = smov (!%p45_p13, %s47_s26), %s1158_s13 }
  0x2d   : > { %1522 = sst [smem:[#allocation26_spill]] %s1556_s3  ;;  %s52_s22 = ssub.s32 %s1154_s12, %s1556_s3 }
  0x2e   : > { %p1323_p5 = por %p64_p2, %p63_p0  ;;  %p49_p7 = scmp.ge.s32.totalorder %s1558_s26, 2 }
  0x2f   : > { %s1328_s28 = sld [smem:[#allocation3 + %s1154_s12]]  ;;  %p1335_p9 = por %p209_p3, %p63_p0 }
  0x30   : > { %s1331_s16 = sld [smem:[#allocation3 + %s1556_s3]]  ;;  %s1560_s26 = smov (%p49_p7, %s1558_s26), 0 }
  0x31   : > { %s1524_s20 = scalar_select %p1335_p9, 1, 0 }
  0x32   : > { %1526 = sst [smem:[#allocation28_spill]] %s1560_s26  ;;  %p783_p11 = scmp.lt.s32.totalorder %s1162_s14, 8 }
  0x33   : > { %1525 = sst [smem:[#allocation27_spill]] %s1524_s20  ;;  %s267_s21 = sand.u32 1, %s1142_s9  }
  0x34   : > { %s51_s24 = ssub.s32 %s1158_s13, %s1560_s26  ;;  %s686_s19 = sshll.u32 %s267_s21, 4 }
  0x35   : > { %s53_s5 = sor.u32 %s52_s22, %s51_s24  ;;  %s687_s0 = sshll.u32 %s1154_s12, 1 }
  0x36   : > { %p54_p12 = scmp.eq.s32.totalorder %s53_s5, 0  ;;  %s1501_s3 = sshll.u32 %s1158_s13, 3 }
  0x37   : > { %s276_s20 = sadd.s32 %s1501_s3, %s687_s0  ;;  %s271_s6 = scalar_lea.vmem [#allocation4], %s686_s19 }
  0x38   : > { %s1348_s7 = scalar_select %p54_p12, %s1142_s9, %s56_s27  }
  0x39   : > { %s281_s11 = sshll.u32 %s271_s6, 4  ;;  %s689_s4 = sshll.u32 %s276_s20, 3  ;;  %s282_s11 = int_to_ptr.vmem [resolvable:$true] %s281_s11 }
  0x3a   : > { %1527 = sst [smem:[#allocation29_spill]] %s1348_s7  ;;  %p769_p3 = pnand %p783_p11, %p1323_p5 }
  0x3b   : > { %s1528_s1 = sld [smem:[#allocation30_spill]]  ;;  %s268_s0 = scalar_lea.sflag [#allocation5], %s267_s21 }
  0x3c   : > { %s1169_s6 = smov 128   ;;  %s1170_s19 = smov 8  }
  0x3d   : > { %s82_s20 = ssub.s32 %s1328_s28, %s1331_s16  ;;  %s86_s7 = sadd.s32 1, %s1130_s30 }
  0x3e   : > { %s83_s3 = sor.u32 %s82_s20, %s51_s24  ;;  %p93_p0 = scmp.ne.s32.totalorder %s1130_s30, %s1126_s29 }
  0x3f   : > { %p84_p13 = scmp.eq.s32.totalorder %s83_s3, 0  ;;  %s293_s26 = sand.u32 1, %s1130_s30  }
  0x40   : > { %p95_p5 = por %p93_p0, %p64_p2  ;;  %s291_s28 = sand.u32 1, %s1162_s14  }
  0x41   : > { %s278_s5 = scalar_lea.hbm %s1528_s1, %s689_s4  ;;  %s1530_s24 = sshll.u32 %s1158_s13, 3 }
  0x42   : > { %s279_s27 = sshll.u32 %s278_s5, 4  ;;  %p1372_p7 = pnand %p783_p11, %p95_p5  ;;  %s280_s27 = int_to_ptr.hbm [resolvable:$true] %s279_s27 }
  0x43   : > { %771 = dma.hbm_to_vmem [thread:$0]  (!%p769_p3), %s280_s27, 256, %s282_s11, %s268_s0, %s1169_s6, %s1169_s6, %s1170_s19  }
  0x44   : > { %s1365_s4 = scalar_select %p84_p13, %s1130_s30, %s86_s7  }
  0x45   : > { %s750_s21 = scalar_select %p95_p5, [#allocation3], [#allocation13] }
  0x46   : > { %s751_s22 = scalar_select %p95_p5, %s1154_s12, 0 }
  0x47   : > { %s1562_s21 = smov (!%p783_p11, %s750_s21), [#allocation14]  ;;  %s690_s11 = sshll.u32 %s293_s26, 3 }
  0x48   : > { %s1564_s22 = smov (!%p783_p11, %s751_s22), 0  ;;  %s295_s7 = scalar_lea.vmem [#allocation7], %s690_s11 }
  0x49   : > { %s296_s3 = sld [smem:[%s1562_s21 + %s1564_s22]]  ;;  %s306_s16 = sshll.u32 %s295_s7, 4  ;;  %s307_s16 = int_to_ptr.vmem [resolvable:$true] %s306_s16 }
  0x4a   : > { %s292_s1 = scalar_lea.sflag [#allocation8], %s291_s28  ;;  %p1000_p11 = pneg %p1372_p7 }
  0x4b   : > { %s1003_s22 = scalar_lea.hbm %s1488_s2, 128 }
  0x4f   : > { %s300_s5 = sadd.s32 %s1530_s24, %s296_s3 }
  0x50   : > { %s692_s27 = sshll.u32 %s300_s5, 3 }
  0x51   : > { %s302_s19 = scalar_lea.hbm %s1488_s2, %s692_s27 }
  0x52   : > { %s304_s20 = sshll.u32 %s302_s19, 4  ;;  %s305_s20 = int_to_ptr.hbm [resolvable:$true] %s304_s20 }
  0x53   : > { %s996_s12 = sshra.s32 %s305_s20, 4  ;;  %s997_s12 = int_to_ptr.hbm [resolvable:$true] %s996_s12 }
  0x54   : > { %s998_s9 = scalar_lea.hbm %s997_s12, 8  ;;  %p1004_p13 = scmp.lt.s32.totalorder %s997_s12, %s1488_s2 }
  0x55   : > { %p999_p2 = scmp.ne.s32.totalorder %s997_s12, %s998_s9  ;;  %p1005_p0 = scmp.lt.s32.totalorder %s1003_s22, %s998_s9 }
  0x57   : > { %p1001_p12 = pnand %p1000_p11, %p999_p2  ;;  %p1006_p5 = por %p1005_p0, %p1004_p13 }
  0x59   : > { %p1002_p3 = pneg %p1001_p12 }
  0x5b   : > { %p1007_p1 = pnand %p1006_p5, %p1002_p3 }
  0x5d   : > { %1010 = shalt.err (!%p1007_p1)
}
  0x5e   : > { %776 = dma.hbm_to_vmem [thread:$0]  (!%p1372_p7), %s305_s20, 128, %s307_s16, %s292_s1  }
  0x5f   : > { %315 = sbr.rel (%p1299_p10) target bundleno = 305 (0x131), region = 44  ;;  %s1400_s28 = sand.u32 (!%p1299_p10), 1, %s1138_s8  }
  0x60   : > { %s694_s7 = sshll.u32 (!%p1299_p10), %s1400_s28, 4  ;;  %s318_s24 = scalar_lea.sflag (!%p1299_p10), [#allocation5], %s1400_s28 }
  0x61   : > { %s321_s9 = scalar_lea.vmem (!%p1299_p10), [#allocation4], %s694_s7 }
  0x64   : > { %1101 = dma.done.wait (%p1280_p4), %s318_s24, 256  }
  0x65   : > { %1103 = vsyncadd (%p1280_p4), %s318_s24, 4294967040  ;;  %s327_s1 = sand.u32 1, %s1270_s15   ;;  %s329_s12 = sand.u32 1, %s1126_s29  }
  0x66   : > { %s695_s23 = sshll.u32 %s329_s12, 3  ;;  %s328_s25 = scalar_lea.sflag [#allocation8], %s327_s1 }
  0x67   : > { %s331_s16 = scalar_lea.vmem [#allocation7], %s695_s23 }
  0x68   : > { %1105 = dma.done.wait (%p1286_p6), %s328_s25, 128  }
  0x69   : > { %1107 = vsyncadd (%p1286_p6), %s328_s25, 4294967168  ;;  %p1531_p1 = scmp.eq.s32.totalorder %s1270_s15, 0 }
  0x6b   : > { %1109 = dma.done.wait (%p1531_p1), [#allocation8], 64   ;;  %p1532_p10 = pmov %p1531_p1 }
  0x6c   : > { %p1533_p4 = pmov %p1531_p1 }
  0x6d   : > { %1111 = vsyncadd (%p1532_p10), [#allocation8], 4294967232 }
  0x6e   : > { %1113 = dma.done.wait (%p1533_p4), [#allocation11], 1024   ;;  %p1534_p7 = pmov %p1531_p1 }
  0x6f   : > { %p385_p2 = scmp.gt.s32.totalorder %s1146_s10, 0  ;;  %v744_v0 = vld [vmem:[#allocation10 + $0x38] sm:$0xff]  ;;  %v743_v2 = vld [vmem:[#allocation10 + $0x30] sm:$0xff]  ;;  %v742_v10 = vld [vmem:[#allocation10 + $0x28] sm:$0xff]  ;;  %vm398_vm0 = vcmask 1043456   ;;  %vm415_vm1 = vcmask 1041408  }
  0x70   : > { %1115 = vsyncadd (%p1534_p7), [#allocation11], 4294966272  ;;  %500 = vmatpush.bf16.msra.mxu0 %v744_v0  ;;  %v379_v3 = vld [vmem:[%s321_s9] sm:$0xff]  ;;  %v380_v6 = vld [vmem:[%s321_s9 + $0x8] sm:$0xff]  ;;  %s1535_s27 = sld [smem:[#allocation32_spill]]  ;;  %s732_s26 = sshll.u32 %s1146_s10, 1 }
  0x71   : > { %s386_s17 = scalar_select %p385_p2, 1, 0  ;;  %v381_v4 = vld [vmem:[#allocation9] sm:$0x7]  ;;  %v388_v5 = vld [vmem:[%s331_s16] sm:$0xff]  ;;  %v741_v17 = vld [vmem:[#allocation10 + $0x20] sm:$0xff] }
  0x72   : > { %v391_v8 = vperm.slane %v381_v4, 0  ;;  %v408_v9 = vperm.slane %v381_v4, 1  ;;  %v382_v14 = vperm.slane %v381_v4, 2  ;;  %v740_v25 = vld [vmem:[#allocation10 + $0x18] sm:$0xff]  ;;  %v739_v32 = vld [vmem:[#allocation10 + $0x10] sm:$0xff]  ;;  %v738_v38 = vld [vmem:[#allocation10 + $0x8] sm:$0xff] }
  0x73   : > { %s387_s5 = scvt.s32.f32 %s386_s17  ;;  %v737_v41 = vld [vmem:[#allocation10] sm:$0xff]  ;;  %s1536_s0 = sld [smem:[#allocation23_spill]] }
  0x74   : > { %501 = vmatpush.bf16.msra.mxu0 %v743_v2  ;;  %v393_v12 = vmul.f32 %v391_v8, %v379_v3  ;;  %v394_v13 = vmul.f32 %v391_v8, %v380_v6  ;;  %v410_v16 = vmul.f32 %v408_v9, %v379_v3  ;;  %v411_v21 = vmul.f32 %v408_v9, %v380_v6  ;;  %s1537_s20 = sld [smem:[#allocation34_spill]]  ;;  %s375_s25 = scalar_lea.vmem [#allocation12], %s694_s7 }
  0x75   : > { %v389_v1 = vstv %s387_s5  ;;  %v383_v22 = vmul.f32 %v382_v14, %v379_v3  ;;  %v384_v23 = vmul.f32 %v382_v14, %v380_v6  ;;  %s1538_s9 = sld [smem:[#allocation35_spill]]  ;;  %s543_s16 = sshll.u32 %s375_s25, 4  ;;  %s544_s16 = int_to_ptr.vmem [resolvable:$true] %s543_s16 }
  0x76   : > { %v390_v7 = vmul.f32 %v389_v1, %v388_v5  ;;  %v400_v19 = vrot.slane %v393_v12, 4  ;;  %v402_v20 = vrot.slane %v394_v13, 4  ;;  %v417_v28 = vrot.slane %v410_v16, 6  ;;  %v884_v37 = vld [vmem:[%s1535_s27] ss:$0 sm:$0xff]  ;;  %s529_s17 = scalar_lea.sflag [#allocation6], %s1400_s28 }
  0x77   : > { %v419_v29 = vrot.slane %v411_v21, 6 }
  0x78   : > { %v392_v11 = vmul.f32 %v391_v8, %v390_v7  ;;  %v409_v15 = vmul.f32 %v408_v9, %v390_v7  ;;  %502 = vmatpush.bf16.msra.mxu0 %v742_v10  ;;  %v403_v27 = vsel %vm398_vm0, %v400_v19, %v402_v20 }
  0x79   : > { %v407_v31 = vadd.f32 %v403_v27, %v384_v23  ;;  %v420_v34 = vsel %vm415_vm1, %v417_v28, %v419_v29  ;;  %s733_s21 = sshll.u32 %s1536_s0, 3 }
  0x7a   : > { %v399_v18 = vrot.slane %v392_v11, 4  ;;  %v416_v24 = vrot.slane %v409_v15, 6  ;;  %v885_v43 = vld [vmem:[%s1537_s20] ss:$0 sm:$0xff]  ;;  %s540_s22 = sadd.s32 %s733_s21, %s732_s26 }
  0x7b   : > { %v424_v36 = vadd.f32 %v420_v34, %v407_v31  ;;  %s734_s11 = sshll.u32 %s540_s22, 3  ;;  %s1539_s1 = smov %s1538_s9 }
  0x7c   : > { %503 = vmatpush.bf16.msra.mxu0 %v741_v17  ;;  %v401_v26 = vsel %vm398_vm0, %v399_v18, %v400_v19  ;;  %v418_v33 = vsel %vm415_vm1, %v416_v24, %v417_v28  ;;  %s542_s23 = scalar_lea.hbm %s1538_s9, %s734_s11  ;;  %s1046_s7 = scalar_lea.hbm %s1539_s1, 128 }
  0x7d   : > { %v406_v30 = vadd.f32 %v401_v26, %v383_v22  ;;  %v430_v40 = vadd.f32 %v884_v37, %v424_v36  ;;  %s545_s10 = sshll.u32 %s542_s23, 4  ;;  %s546_s10 = int_to_ptr.hbm [resolvable:$true] %s545_s10 }
  0x7e   : > { %s1040_s5 = sshra.s32 %s546_s10, 4  ;;  %s1041_s5 = int_to_ptr.hbm [resolvable:$true] %s1040_s5 }
  0x7f   : > { %v423_v35 = vadd.f32 %v418_v33, %v406_v30  ;;  %s1042_s15 = scalar_lea.hbm %s1041_s5, 16  ;;  %p1047_p3 = scmp.lt.s32.totalorder %s1041_s5, %s1539_s1 }
  0x80   : > { %504 = vmatpush.bf16.msra.mxu0 %v740_v25  ;;  %p1043_p6 = scmp.ne.s32.totalorder %s1041_s5, %s1042_s15  ;;  %p1048_p13 = scmp.lt.s32.totalorder %s1046_s7, %s1042_s15 }
  0x81   : > { %v429_v39 = vadd.f32 %v884_v37, %v423_v35 }
  0x82   : > { %p1044_p11 = pnand %p1043_p6, %p1335_p9  ;;  %p1049_p0 = por %p1048_p13, %p1047_p3 }
  0x83   : > { %v431_v42 = vpack.c.bf16 %v430_v40, %v429_v39 }
  0x84   : > { %505 = vmatpush.bf16.msra.mxu0 %v739_v32  ;;  %p1045_p12 = pneg %p1044_p11 }
  0x86   : > { %p1050_p5 = pnand %p1049_p0, %p1045_p12 }
  0x88   : > { %506 = vmatpush.bf16.msra.mxu0 %v738_v38 }
  0x8c   : > { %507 = vmatpush.bf16.msra.mxu0 %v737_v41 }
  0x8f   : > { %508 = vmatmul.bf16.vlgmr.msra.gmra.mxu0 %v431_v42 }
 0x10c   : > { %v509_v44 = vpop.f32.mrf.mxu0 }
 0x10d   : > { %v510_v45 = vadd.f32 %v885_v43, %v509_v44 }
 0x10f   : > { %v514_v46 = vsub.f32 0.0, %v510_v45 }
 0x111   : > { %v516_v47 = vmul.f32 1.442695, %v514_v46 }
 0x113   : > { %886 = vpow2.f32 %v516_v47 }
 0x114   : > { %v511_v48 = vpop.f32.mrf.mxu0 }
 0x115   : > { %v512_v49 = vadd.f32 %v885_v43, %v511_v48 }
 0x117   : > { %v515_v50 = vsub.f32 0.0, %v512_v49 }
 0x119   : > { %v887_v51 = vpop.eup %886  ;;  %v518_v52 = vmul.f32 1.442695, %v515_v50 }
 0x11a   : > { %v520_v53 = vadd.f32 1.0, %v887_v51 }
 0x11b   : > { %888 = vpow2.f32 %v518_v52 }
 0x11c   : > { %890 = vrcp.f32 %v520_v53 }
 0x121   : > { %v889_v54 = vpop.eup %888 }
 0x122   : > { %v891_v55 = vpop.eup %890  ;;  %v521_v56 = vadd.f32 1.0, %v889_v54 }
 0x123   : > { %v524_v57 = vmul.f32 %v891_v55, %v510_v45 }
 0x124   : > { %892 = vrcp.f32 %v521_v56 }
 0x125   : > { %526 = vst [vmem:[%s375_s25] sm:$0xff] %v524_v57 }
 0x12a   : > { %v893_v58 = vpop.eup %892 }
 0x12b   : > { %v525_v59 = vmul.f32 %v893_v58, %v512_v49 }
 0x12d   : > { %527 = vst [vmem:[%s375_s25 + $0x8] sm:$0xff] %v525_v59 }
 0x12e   : > { %1053 = shalt.err (!%p1050_p5)
}
 0x12f   : > { %s1171_s28 = smov 128   ;;  %s1172_s19 = smov 8  }
 0x130   : > { %759 = dma.vmem_to_hbm [thread:$0]  (%p1335_p9), %s544_s16, 256, %s546_s10, %s529_s17, %s1171_s28, %s1171_s28, %s1172_s19  }
 0x131 PF: > { %s1541_s20 = sld [smem:[#allocation21_spill]]  ;;  %p786_p1 = scmp.ge.s32.totalorder %s1162_s14, 2 }
 0x133   : > { %p778_p10 = pnand %p786_p1, %p1291_p8 }
 0x135   : > { %p779_p4 = pneg %p778_p10 }
 0x137   : > { %s560_s21 = sand.u32 1, %s1541_s20  }
 0x138   : > { %s561_s22 = scalar_lea.sflag [#allocation6], %s560_s21 }
 0x139   : > { %1117 = dma.done.wait (%p779_p4), %s561_s22, 256  }
 0x13a   : > { %1119 = vsyncadd (%p779_p4), %s561_s22, 4294967040  ;;  %s35_s14 = sadd.s32 1, %s1162_s14   ;;  %s1543_s11 = sld [smem:[#allocation22_spill]] }
 0x13b   : > { %p32_p7 = scmp.ge.s32.totalorder %s35_s14, 10   ;;  %s1544_s9 = sld [smem:[#allocation29_spill]] }
 0x13c   : > { %s1545_s10 = sld [smem:[#allocation24_spill]]  ;;  %s1548_s28 = smov %s1126_s29 }
 0x13d   : > { %s1546_s12 = sld [smem:[#allocation26_spill]]  ;;  %s1549_s29 = smov %s1130_s30 }
 0x13e   : > { %s1547_s3 = sld [smem:[#allocation28_spill]]  ;;  %s1550_s30 = smov %s1365_s4 }
 0x13f   : > { %s1551_s0 = smov %s1138_s8 }
 0x140   : > { %s1552_s8 = smov %s1543_s11  ;;  %s1553_s11 = smov %s1158_s13 }
 0x141   :  { %34 = sbr.rel (!%p32_p7) target bundleno = 23 (0x17), region = 110 }
 0x144   : > { %s1554_s13 = smov %s1547_s3 }
 0x146   :  { %567 = vsyncpa [#allocation5], 1 }
 0x147   :  { %569 = vsyncpa [#allocation5 + $0x1], 1 }
 0x148   :  { %570 = vsyncpa [#allocation8], 1 }
 0x149   :  { %572 = vsyncpa [#allocation8 + $0x1], 1 }
 0x14a   :  { %573 = vsyncpa [#allocation11], 1 }
 0x14b   :  { %574 = vsyncpa [#allocation6], 1 }
 0x14c   :  { %576 = vsyncpa [#allocation6 + $0x1], 1 }

</bundles_post_ra>
